<compile_context>
chip_gen: v7x
topology: tpu7x:2x2x1
jax: 0.10.0
libtpu: 0.0.40
codegen_flags: <defaults>
</compile_context>

<pallas_src>
import jax
import jax.numpy as jnp
import numpy as np
from jax.experimental import pallas as pl
from jax.experimental.pallas import tpu as pltpu


def _round_up(x, m):
    return ((x + m - 1) // m) * m


# ----------------------------------------------------------------------------
# Pallas forward
# ----------------------------------------------------------------------------
def regression_cnn1d_forward(x_ncl, params, output_dim, output_len):
    """x_ncl: (B, C_in, L) float32 (PyTorch NCL layout). Returns (B, output_dim, output_len)."""
    B, c_in, L = x_ncl.shape
    C = 8                                   # _last_conv_channels
    ODOL = output_dim * output_len
    f32 = jnp.float32

    NF0 = L * c_in                          # real lanes of the conv1 input
    NF = L * C                              # real lanes of every conv output
    NF0p = _round_up(NF0, 128)              # lane-padded widths (lane-dense vregs)
    NFp = _round_up(NF, 128)
    ODp = _round_up(ODOL, 128)              # lane-dense output width

    # ---- batch blocking: >=2 blocks when B>=2 (both v7x TCs busy), <=128/block ----
    nblocks = 1 if B < 2 else max(2, -(-B // 128))
    TB = -(-B // nblocks)
    B_pad = nblocks * TB

    # ---- parameter re-layout (wrapper glue, plain JAX) ----
    def conv_weight_lanes(w_ock, p_in, p_out):
        # torch Conv1d weight (C_out, C_in, 3) -> block-diagonal matmul weight
        # (3*p_in, p_out): row k*p_in + l*C_in + c, column l*C_out + o holds w[o, c, k].
        c_out, cin, K = w_ock.shape
        w_kco = jnp.transpose(w_ock, (2, 1, 0)).astype(f32)          # (3, Cin, Cout)
        eye = jnp.eye(L, dtype=f32)
        big = jnp.einsum("kco,lm->klcmo", w_kco, eye)                # (3, L, Cin, L, Cout)
        big = big.reshape(K, L * cin, L * c_out)
        big = jnp.pad(big, ((0, 0), (0, p_in - L * cin), (0, p_out - L * c_out)))
        return big.reshape(K * p_in, p_out)

    def conv_bias_lanes(b, p_out):
        bl = jnp.tile(b.astype(f32), L)                              # lane l*C_out + o
        return jnp.pad(bl, (0, p_out - bl.shape[0])).reshape(1, p_out)

    w1 = conv_weight_lanes(params["conv1_w"], NF0p, NFp)             # (3*NF0p, NFp)
    w2 = conv_weight_lanes(params["conv2_w"], NFp, NFp)              # (3*NFp, NFp)
    w3 = conv_weight_lanes(params["conv3_w"], NFp, NFp)
    b1 = conv_bias_lanes(params["conv1_b"], NFp)
    b2 = conv_bias_lanes(params["conv2_b"], NFp)
    b3 = conv_bias_lanes(params["conv3_b"], NFp)

    # fc1: torch weight (32, C*L) indexed by f = c*L + l; kernel lane j = l*C + c.
    f1w = params["fc1_w"].reshape(32, C, L).transpose(2, 1, 0).reshape(NF, 32)
    f1w = jnp.pad(f1w.astype(f32), ((0, NFp - NF), (0, 0)))          # (NFp, 32)
    f1b = params["fc1_b"].astype(f32).reshape(1, 32)
    f2w = params["fc2_w"].T.astype(f32)                              # (32, 16)
    f2b = params["fc2_b"].astype(f32).reshape(1, 16)
    f3w = jnp.pad(params["fc3_w"].T.astype(f32), ((0, 0), (0, ODp - ODOL)))   # (16, ODp)
    f3b = jnp.pad(params["fc3_b"].astype(f32), (0, ODp - ODOL)).reshape(1, ODp)

    # ---- input re-layout: (B, Cin, L) -> lane-flat (nblocks, TB, NF0p), lane = l*Cin + c ----
    x2d = jnp.transpose(x_ncl, (0, 2, 1)).reshape(B, NF0).astype(f32)
    x2d = jnp.pad(x2d, ((0, B_pad - B), (0, NF0p - NF0)))
    x3d = x2d.reshape(nblocks, TB, NF0p)

    # ---- kernel ----
    def kernel(x_ref, w1_ref, b1_ref, w2_ref, b2_ref, w3_ref, b3_ref,
               f1w_ref, f1b_ref, f2w_ref, f2b_ref, f3w_ref, f3b_ref, out_ref):

        def conv_relu(h, w_ref, b_ref, feat):
            # h: (TB, P) lane-flat activations (lane j = l*feat + c); lanes past the
            # real L*feat region are zero.  'same' conv, kernel 3, as ONE im2col matmul:
            #   im = [ shift_right_by_feat | h | shift_left_by_feat ]  (zero fill at ends)
            tb, p = h.shape
            zpad = jnp.zeros((tb, feat), f32)
            im = jnp.concatenate(
                [zpad, h[:, :p - feat],        # tap k=0: position l-1 (zero at l=0)
                 h,                            # tap k=1: position l
                 h[:, feat:], zpad],           # tap k=2: position l+1 (zero at l=L-1)
                axis=-1)                       # (TB, 3P)
            y = jnp.dot(im, w_ref[...], preferred_element_type=f32) + b_ref[...]
            return jnp.maximum(y, 0.0)

        x = x_ref[0]                                        # (TB, NF0p)
        h = conv_relu(x, w1_ref, b1_ref, c_in)              # (TB, NFp), lane = l*8 + c
        h = conv_relu(h, w2_ref, b2_ref, C)
        h = conv_relu(h, w3_ref, b3_ref, C)

        # flatten is free: h already is (TB, L*C) in l*C + c order
        h1 = jnp.maximum(
            jnp.dot(h, f1w_ref[...], preferred_element_type=f32) + f1b_ref[...], 0.0)
        h2 = jnp.dot(h1, f2w_ref[...], preferred_element_type=f32) + f2b_ref[...]
        h3 = jnp.dot(h2, f3w_ref[...], preferred_element_type=f32) + f3b_ref[...]
        out_ref[0] = h3                                     # (TB, ODp), lane-dense store

    def const_spec(shape):
        return pl.BlockSpec(shape, lambda i: (0,) * len(shape))

    out = pl.pallas_call(
        kernel,
        out_shape=jax.ShapeDtypeStruct((nblocks, TB, ODp), f32),
        grid=(nblocks,),
        in_specs=[
            pl.BlockSpec((1, TB, NF0p), lambda i: (i, 0, 0)),          # x batch block
            const_spec((3 * NF0p, NFp)), const_spec((1, NFp)),         # conv1
            const_spec((3 * NFp, NFp)), const_spec((1, NFp)),          # conv2
            const_spec((3 * NFp, NFp)), const_spec((1, NFp)),          # conv3
            const_spec((NFp, 32)), const_spec((1, 32)),                # fc1
            const_spec((32, 16)), const_spec((1, 16)),                 # fc2
            const_spec((16, ODp)), const_spec((1, ODp)),               # fc3 (padded)
        ],
        out_specs=pl.BlockSpec((1, TB, ODp), lambda i: (i, 0, 0)),
        compiler_params=pltpu.CompilerParams(dimension_semantics=("parallel",)),
    )(x3d, w1, b1, w2, b2, w3, b3, f1w, f1b, f2w, f2b, f3w, f3b)

    out = out.reshape(B_pad, ODp)[:B, :ODOL]
    return out.reshape(B, output_dim, output_len)


# ----------------------------------------------------------------------------
# Pure-JAX reference (PyTorch semantics) for validation
# ----------------------------------------------------------------------------
def reference_forward(x_ncl, params, output_dim, output_len):
    B, _, L = x_ncl.shape

    def conv(x, w, b):  # x: (B, C, L), w: (O, C, 3) — cross-correlation, 'same' pad
        xp = jnp.pad(x, ((0, 0), (0, 0), (1, 1)))
        y = 0.0
        for k in range(3):
            y = y + jnp.einsum("oc,bcl->bol", w[:, :, k], xp[:, :, k:k + L])
        return jax.nn.relu(y + b[None, :, None])

    h = conv(x_ncl, params["conv1_w"], params["conv1_b"])
    h = conv(h, params["conv2_w"], params["conv2_b"])
    h = conv(h, params["conv3_w"], params["conv3_b"])
    flat = h.reshape(B, -1)                                          # (B, 8*L), order c*L + l
    h1 = jax.nn.relu(flat @ params["fc1_w"].T + params["fc1_b"])
    h2 = h1 @ params["fc2_w"].T + params["fc2_b"]
    h3 = h2 @ params["fc3_w"].T + params["fc3_b"]
    return h3.reshape(B, output_dim, output_len)


# ----------------------------------------------------------------------------
if __name__ == "__main__":
    input_dim, input_len = 4, 16
    output_dim, output_len = 3, 8
    batch = 2
    C = 8

    key = jax.random.PRNGKey(0)
    ks = jax.random.split(key, 13)

    def rnd(k, shape, scale=0.1):
        return (scale * jax.random.normal(k, shape)).astype(jnp.float32)

    params = {
        "conv1_w": rnd(ks[0], (C, input_dim, 3)),
        "conv1_b": rnd(ks[1], (C,)),
        "conv2_w": rnd(ks[2], (C, C, 3)),
        "conv2_b": rnd(ks[3], (C,)),
        "conv3_w": rnd(ks[4], (C, C, 3)),
        "conv3_b": rnd(ks[5], (C,)),
        "fc1_w": rnd(ks[6], (32, C * input_len)),
        "fc1_b": rnd(ks[7], (32,)),
        "fc2_w": rnd(ks[8], (16, 32)),
        "fc2_b": rnd(ks[9], (16,)),
        "fc3_w": rnd(ks[10], (output_dim * output_len, 16)),
        "fc3_b": rnd(ks[11], (output_dim * output_len,)),
    }

    x = jax.random.normal(ks[12], (batch, input_dim, input_len), dtype=jnp.float32)

    out = regression_cnn1d_forward(x, params, output_dim, output_len)
    out = jax.block_until_ready(out)

    ref = jax.block_until_ready(reference_forward(x, params, output_dim, output_len))
    np.testing.assert_allclose(np.asarray(out), np.asarray(ref), atol=1e-3, rtol=1e-3)

    assert out.shape == (batch, output_dim, output_len)
    print("KERNEL_OK")
</pallas_src>

<mosaic_0001>
module attributes {stable_mosaic.version = 11 : i64} {
  func.func @kernel(%arg0: i32, %arg1: memref<1x1x128xf32, #tpu.memory_space<vmem>>, %arg2: memref<384x128xf32, #tpu.memory_space<vmem>>, %arg3: memref<1x128xf32, #tpu.memory_space<vmem>>, %arg4: memref<384x128xf32, #tpu.memory_space<vmem>>, %arg5: memref<1x128xf32, #tpu.memory_space<vmem>>, %arg6: memref<384x128xf32, #tpu.memory_space<vmem>>, %arg7: memref<1x128xf32, #tpu.memory_space<vmem>>, %arg8: memref<128x32xf32, #tpu.memory_space<vmem>>, %arg9: memref<1x32xf32, #tpu.memory_space<vmem>>, %arg10: memref<32x16xf32, #tpu.memory_space<vmem>>, %arg11: memref<1x16xf32, #tpu.memory_space<vmem>>, %arg12: memref<16x128xf32, #tpu.memory_space<vmem>>, %arg13: memref<1x128xf32, #tpu.memory_space<vmem>>, %arg14: memref<1x1x128xf32, #tpu.memory_space<vmem>>) attributes {dimension_semantics = [#tpu.dimension_semantics<parallel>], iteration_bounds = array<i64: 2>, scalar_prefetch = 0 : i64, scratch_operands = 0 : i64, tpu.core_type = #tpu.core_type<tc>, window_params = [{transform_indices = @transform_0, window_bounds = array<i64: 1, 1, 128>}, {pipeline_mode = #tpu.pipeline_mode<synchronous>, transform_indices = @transform_1, window_bounds = array<i64: 384, 128>}, {pipeline_mode = #tpu.pipeline_mode<synchronous>, transform_indices = @transform_2, window_bounds = array<i64: 1, 128>}, {pipeline_mode = #tpu.pipeline_mode<synchronous>, transform_indices = @transform_3, window_bounds = array<i64: 384, 128>}, {pipeline_mode = #tpu.pipeline_mode<synchronous>, transform_indices = @transform_4, window_bounds = array<i64: 1, 128>}, {pipeline_mode = #tpu.pipeline_mode<synchronous>, transform_indices = @transform_5, window_bounds = array<i64: 384, 128>}, {pipeline_mode = #tpu.pipeline_mode<synchronous>, transform_indices = @transform_6, window_bounds = array<i64: 1, 128>}, {pipeline_mode = #tpu.pipeline_mode<synchronous>, transform_indices = @transform_7, window_bounds = array<i64: 128, 32>}, {pipeline_mode = #tpu.pipeline_mode<synchronous>, transform_indices = @transform_8, window_bounds = array<i64: 1, 32>}, {pipeline_mode = #tpu.pipeline_mode<synchronous>, transform_indices = @transform_9, window_bounds = array<i64: 32, 16>}, {pipeline_mode = #tpu.pipeline_mode<synchronous>, transform_indices = @transform_10, window_bounds = array<i64: 1, 16>}, {pipeline_mode = #tpu.pipeline_mode<synchronous>, transform_indices = @transform_11, window_bounds = array<i64: 16, 128>}, {pipeline_mode = #tpu.pipeline_mode<synchronous>, transform_indices = @transform_12, window_bounds = array<i64: 1, 128>}, {transform_indices = @transform_13, window_bounds = array<i64: 1, 1, 128>}]} {
    %c0 = arith.constant 0 : index
    %c0_0 = arith.constant 0 : index
    %c0_1 = arith.constant 0 : index
    %0 = vector.load %arg1[%c0, %c0_0, %c0_1] : memref<1x1x128xf32, #tpu.memory_space<vmem>>, vector<1x1x128xf32>
    %1 = vector.shape_cast %0 : vector<1x1x128xf32> to vector<1x128xf32>
    %cst = arith.constant 0.000000e+00 : f32
    %2 = vector.broadcast %cst : f32 to vector<1x4xf32>
    %3 = vector.extract_strided_slice %1 {offsets = [0, 0], sizes = [1, 124], strides = [1, 1]} : vector<1x128xf32> to vector<1x124xf32>
    %4 = vector.extract_strided_slice %1 {offsets = [0, 4], sizes = [1, 124], strides = [1, 1]} : vector<1x128xf32> to vector<1x124xf32>
    %5 = tpu.concatenate %2, %3, %1, %4, %2 in 1 : vector<1x4xf32>, vector<1x124xf32>, vector<1x128xf32>, vector<1x124xf32>, vector<1x4xf32> -> vector<1x384xf32>
    %c0_2 = arith.constant 0 : index
    %c0_3 = arith.constant 0 : index
    %6 = vector.load %arg2[%c0_2, %c0_3] : memref<384x128xf32, #tpu.memory_space<vmem>>, vector<384x128xf32>
    %cst_4 = arith.constant dense<0.000000e+00> : vector<1x128xf32>
    %7 = tpu.matmul %5, %6, %cst_4 {dimension_numbers = #tpu.dot_dimension_numbers<[1], [0], [0], [1], [0, 0, 1, 1], [], []>} : vector<1x384xf32>, vector<384x128xf32>, vector<1x128xf32> -> vector<1x128xf32>
    %c0_5 = arith.constant 0 : index
    %c0_6 = arith.constant 0 : index
    %8 = vector.load %arg3[%c0_5, %c0_6] : memref<1x128xf32, #tpu.memory_space<vmem>>, vector<1x128xf32>
    %9 = arith.addf %7, %8 : vector<1x128xf32>
    %cst_7 = arith.constant 0.000000e+00 : f32
    %10 = vector.broadcast %cst_7 : f32 to vector<1x128xf32>
    %11 = arith.maximumf %9, %10 : vector<1x128xf32>
    %cst_8 = arith.constant 0.000000e+00 : f32
    %12 = vector.broadcast %cst_8 : f32 to vector<1x8xf32>
    %13 = vector.extract_strided_slice %11 {offsets = [0, 0], sizes = [1, 120], strides = [1, 1]} : vector<1x128xf32> to vector<1x120xf32>
    %14 = vector.extract_strided_slice %11 {offsets = [0, 8], sizes = [1, 120], strides = [1, 1]} : vector<1x128xf32> to vector<1x120xf32>
    %15 = tpu.concatenate %12, %13, %11, %14, %12 in 1 : vector<1x8xf32>, vector<1x120xf32>, vector<1x128xf32>, vector<1x120xf32>, vector<1x8xf32> -> vector<1x384xf32>
    %c0_9 = arith.constant 0 : index
    %c0_10 = arith.constant 0 : index
    %16 = vector.load %arg4[%c0_9, %c0_10] : memref<384x128xf32, #tpu.memory_space<vmem>>, vector<384x128xf32>
    %cst_11 = arith.constant dense<0.000000e+00> : vector<1x128xf32>
    %17 = tpu.matmul %15, %16, %cst_11 {dimension_numbers = #tpu.dot_dimension_numbers<[1], [0], [0], [1], [0, 0, 1, 1], [], []>} : vector<1x384xf32>, vector<384x128xf32>, vector<1x128xf32> -> vector<1x128xf32>
    %c0_12 = arith.constant 0 : index
    %c0_13 = arith.constant 0 : index
    %18 = vector.load %arg5[%c0_12, %c0_13] : memref<1x128xf32, #tpu.memory_space<vmem>>, vector<1x128xf32>
    %19 = arith.addf %17, %18 : vector<1x128xf32>
    %cst_14 = arith.constant 0.000000e+00 : f32
    %20 = vector.broadcast %cst_14 : f32 to vector<1x128xf32>
    %21 = arith.maximumf %19, %20 : vector<1x128xf32>
    %cst_15 = arith.constant 0.000000e+00 : f32
    %22 = vector.broadcast %cst_15 : f32 to vector<1x8xf32>
    %23 = vector.extract_strided_slice %21 {offsets = [0, 0], sizes = [1, 120], strides = [1, 1]} : vector<1x128xf32> to vector<1x120xf32>
    %24 = vector.extract_strided_slice %21 {offsets = [0, 8], sizes = [1, 120], strides = [1, 1]} : vector<1x128xf32> to vector<1x120xf32>
    %25 = tpu.concatenate %22, %23, %21, %24, %22 in 1 : vector<1x8xf32>, vector<1x120xf32>, vector<1x128xf32>, vector<1x120xf32>, vector<1x8xf32> -> vector<1x384xf32>
    %c0_16 = arith.constant 0 : index
    %c0_17 = arith.constant 0 : index
    %26 = vector.load %arg6[%c0_16, %c0_17] : memref<384x128xf32, #tpu.memory_space<vmem>>, vector<384x128xf32>
    %cst_18 = arith.constant dense<0.000000e+00> : vector<1x128xf32>
    %27 = tpu.matmul %25, %26, %cst_18 {dimension_numbers = #tpu.dot_dimension_numbers<[1], [0], [0], [1], [0, 0, 1, 1], [], []>} : vector<1x384xf32>, vector<384x128xf32>, vector<1x128xf32> -> vector<1x128xf32>
    %c0_19 = arith.constant 0 : index
    %c0_20 = arith.constant 0 : index
    %28 = vector.load %arg7[%c0_19, %c0_20] : memref<1x128xf32, #tpu.memory_space<vmem>>, vector<1x128xf32>
    %29 = arith.addf %27, %28 : vector<1x128xf32>
    %cst_21 = arith.constant 0.000000e+00 : f32
    %30 = vector.broadcast %cst_21 : f32 to vector<1x128xf32>
    %31 = arith.maximumf %29, %30 : vector<1x128xf32>
    %c0_22 = arith.constant 0 : index
    %c0_23 = arith.constant 0 : index
    %32 = vector.load %arg8[%c0_22, %c0_23] : memref<128x32xf32, #tpu.memory_space<vmem>>, vector<128x32xf32>
    %cst_24 = arith.constant dense<0.000000e+00> : vector<1x32xf32>
    %33 = tpu.matmul %31, %32, %cst_24 {dimension_numbers = #tpu.dot_dimension_numbers<[1], [0], [0], [1], [0, 0, 1, 1], [], []>} : vector<1x128xf32>, vector<128x32xf32>, vector<1x32xf32> -> vector<1x32xf32>
    %c0_25 = arith.constant 0 : index
    %c0_26 = arith.constant 0 : index
    %34 = vector.load %arg9[%c0_25, %c0_26] : memref<1x32xf32, #tpu.memory_space<vmem>>, vector<1x32xf32>
    %35 = arith.addf %33, %34 : vector<1x32xf32>
    %cst_27 = arith.constant 0.000000e+00 : f32
    %36 = vector.broadcast %cst_27 : f32 to vector<1x32xf32>
    %37 = arith.maximumf %35, %36 : vector<1x32xf32>
    %c0_28 = arith.constant 0 : index
    %c0_29 = arith.constant 0 : index
    %38 = vector.load %arg10[%c0_28, %c0_29] : memref<32x16xf32, #tpu.memory_space<vmem>>, vector<32x16xf32>
    %cst_30 = arith.constant dense<0.000000e+00> : vector<1x16xf32>
    %39 = tpu.matmul %37, %38, %cst_30 {dimension_numbers = #tpu.dot_dimension_numbers<[1], [0], [0], [1], [0, 0, 1, 1], [], []>} : vector<1x32xf32>, vector<32x16xf32>, vector<1x16xf32> -> vector<1x16xf32>
    %c0_31 = arith.constant 0 : index
    %c0_32 = arith.constant 0 : index
    %40 = vector.load %arg11[%c0_31, %c0_32] : memref<1x16xf32, #tpu.memory_space<vmem>>, vector<1x16xf32>
    %41 = arith.addf %39, %40 : vector<1x16xf32>
    %c0_33 = arith.constant 0 : index
    %c0_34 = arith.constant 0 : index
    %42 = vector.load %arg12[%c0_33, %c0_34] : memref<16x128xf32, #tpu.memory_space<vmem>>, vector<16x128xf32>
    %cst_35 = arith.constant dense<0.000000e+00> : vector<1x128xf32>
    %43 = tpu.matmul %41, %42, %cst_35 {dimension_numbers = #tpu.dot_dimension_numbers<[1], [0], [0], [1], [0, 0, 1, 1], [], []>} : vector<1x16xf32>, vector<16x128xf32>, vector<1x128xf32> -> vector<1x128xf32>
    %c0_36 = arith.constant 0 : index
    %c0_37 = arith.constant 0 : index
    %44 = vector.load %arg13[%c0_36, %c0_37] : memref<1x128xf32, #tpu.memory_space<vmem>>, vector<1x128xf32>
    %45 = arith.addf %43, %44 : vector<1x128xf32>
    %c0_38 = arith.constant 0 : index
    %c0_39 = arith.constant 0 : index
    %c0_40 = arith.constant 0 : index
    %46 = vector.load %arg14[%c0_38, %c0_39, %c0_40] : memref<1x1x128xf32, #tpu.memory_space<vmem>>, vector<1x1x128xf32>
    %47 = vector.shape_cast %46 : vector<1x1x128xf32> to vector<1x128xf32>
    %48 = vector.shape_cast %45 : vector<1x128xf32> to vector<1x1x128xf32>
    tpu.vector_store %arg14[%c0_38, %c0_39, %c0_40], %48 {strides = array<i32>} : memref<1x1x128xf32, #tpu.memory_space<vmem>>, vector<1x1x128xf32>,
    return
  }
  func.func @transform_0(%arg0: i32) -> (i32, i32, i32) {
    %c0_i32 = arith.constant 0 : i32
    %c0_i32_0 = arith.constant 0 : i32
    %c0_i32_1 = arith.constant 0 : i32
    return %arg0, %c0_i32, %c0_i32_0 : i32, i32, i32
  }
  func.func @transform_1(%arg0: i32) -> (i32, i32) {
    %c0_i32 = arith.constant 0 : i32
    %c0_i32_0 = arith.constant 0 : i32
    %c0_i32_1 = arith.constant 0 : i32
    return %c0_i32, %c0_i32_0 : i32, i32
  }
  func.func @transform_2(%arg0: i32) -> (i32, i32) {
    %c0_i32 = arith.constant 0 : i32
    %c0_i32_0 = arith.constant 0 : i32
    %c0_i32_1 = arith.constant 0 : i32
    return %c0_i32, %c0_i32_0 : i32, i32
  }
  func.func @transform_3(%arg0: i32) -> (i32, i32) {
    %c0_i32 = arith.constant 0 : i32
    %c0_i32_0 = arith.constant 0 : i32
    %c0_i32_1 = arith.constant 0 : i32
    return %c0_i32, %c0_i32_0 : i32, i32
  }
  func.func @transform_4(%arg0: i32) -> (i32, i32) {
    %c0_i32 = arith.constant 0 : i32
    %c0_i32_0 = arith.constant 0 : i32
    %c0_i32_1 = arith.constant 0 : i32
    return %c0_i32, %c0_i32_0 : i32, i32
  }
  func.func @transform_5(%arg0: i32) -> (i32, i32) {
    %c0_i32 = arith.constant 0 : i32
    %c0_i32_0 = arith.constant 0 : i32
    %c0_i32_1 = arith.constant 0 : i32
    return %c0_i32, %c0_i32_0 : i32, i32
  }
  func.func @transform_6(%arg0: i32) -> (i32, i32) {
    %c0_i32 = arith.constant 0 : i32
    %c0_i32_0 = arith.constant 0 : i32
    %c0_i32_1 = arith.constant 0 : i32
    return %c0_i32, %c0_i32_0 : i32, i32
  }
  func.func @transform_7(%arg0: i32) -> (i32, i32) {
    %c0_i32 = arith.constant 0 : i32
    %c0_i32_0 = arith.constant 0 : i32
    %c0_i32_1 = arith.constant 0 : i32
    return %c0_i32, %c0_i32_0 : i32, i32
  }
  func.func @transform_8(%arg0: i32) -> (i32, i32) {
    %c0_i32 = arith.constant 0 : i32
    %c0_i32_0 = arith.constant 0 : i32
    %c0_i32_1 = arith.constant 0 : i32
    return %c0_i32, %c0_i32_0 : i32, i32
  }
  func.func @transform_9(%arg0: i32) -> (i32, i32) {
    %c0_i32 = arith.constant 0 : i32
    %c0_i32_0 = arith.constant 0 : i32
    %c0_i32_1 = arith.constant 0 : i32
    return %c0_i32, %c0_i32_0 : i32, i32
  }
  func.func @transform_10(%arg0: i32) -> (i32, i32) {
    %c0_i32 = arith.constant 0 : i32
    %c0_i32_0 = arith.constant 0 : i32
    %c0_i32_1 = arith.constant 0 : i32
    return %c0_i32, %c0_i32_0 : i32, i32
  }
  func.func @transform_11(%arg0: i32) -> (i32, i32) {
    %c0_i32 = arith.constant 0 : i32
    %c0_i32_0 = arith.constant 0 : i32
    %c0_i32_1 = arith.constant 0 : i32
    return %c0_i32, %c0_i32_0 : i32, i32
  }
  func.func @transform_12(%arg0: i32) -> (i32, i32) {
    %c0_i32 = arith.constant 0 : i32
    %c0_i32_0 = arith.constant 0 : i32
    %c0_i32_1 = arith.constant 0 : i32
    return %c0_i32, %c0_i32_0 : i32, i32
  }
  func.func @transform_13(%arg0: i32) -> (i32, i32, i32) {
    %c0_i32 = arith.constant 0 : i32
    %c0_i32_0 = arith.constant 0 : i32
    %c0_i32_1 = arith.constant 0 : i32
    return %arg0, %c0_i32, %c0_i32_0 : i32, i32, i32
  }
}

</mosaic_0001>

<bundles_post_ra>
// kernel: tpu_custom_call.1
= control target key start
LH: loop header
LB: loop body
LE: loop exit
PB: predicated region body
PF: predicated region fallthrough
CT: control target
= control target key end

     0   :  { %s2659_s0 = inlined_call_operand.vmem [shape: f32[2,1,128], index: 0, kind: input, shape index: {}]   ;;  %s2660_s1 = inlined_call_operand.hbm [shape: f32[384,128], index: 1, kind: input, shape index: {}]   ;;  %s2661_s2 = inlined_call_operand.vmem [shape: f32[1,128], index: 2, kind: input, shape index: {}]   ;;  %s2662_s3 = inlined_call_operand.hbm [shape: f32[384,128], index: 3, kind: input, shape index: {}]   ;;  %s2663_s4 = inlined_call_operand.vmem [shape: f32[1,128], index: 4, kind: input, shape index: {}]   ;;  %s2664_s5 = inlined_call_operand.hbm [shape: f32[384,128], index: 5, kind: input, shape index: {}]   ;;  %s2665_s6 = inlined_call_operand.vmem [shape: f32[1,128], index: 6, kind: input, shape index: {}]   ;;  %s2666_s7 = inlined_call_operand.vmem [shape: f32[128,32], index: 7, kind: input, shape index: {}]   ;;  %s2667_s8 = inlined_call_operand.vmem [shape: f32[1,32], index: 8, kind: input, shape index: {}]   ;;  %s2668_s9 = inlined_call_operand.vmem [shape: f32[32,16], index: 9, kind: input, shape index: {}]   ;;  %s2669_s10 = inlined_call_operand.vmem [shape: f32[1,16], index: 10, kind: input, shape index: {}]   ;;  %s2670_s11 = inlined_call_operand.vmem [shape: f32[16,128], index: 11, kind: input, shape index: {}]   ;;  %s2671_s12 = inlined_call_operand.vmem [shape: f32[1,128], index: 12, kind: input, shape index: {}]   ;;  %s2672_s13 = inlined_call_operand.hbm [shape: f32[2,1,128], index: 13, kind: output, shape index: {}]  }
   0x1   :  { %2685 = sst [smem:[#allocation19_spill]] %s2671_s12 }
   0x2   :  { %2686 = sst [smem:[#allocation20_spill]] %s2672_s13 }
   0x3   :  { %18 = vsyncpa [#allocation3], 0 }
   0x4   :  { %19 = vsyncpa [#allocation6], 0 }
   0x5   :  { %20 = vsyncpa [#allocation4], 0 }
   0x6   :  { %22 = vsyncpa [#allocation4 + $0x1], 0  ;;  %s2305_s25 = smov 0   ;;  %s2307_s26 = smov 0  }
   0x7   :  { %s2309_s27 = smov 0   ;;  %s2311_s28 = smov 0  }
   0x8 LB: > { %2687 = sst [smem:[#allocation12_spill]] %s2208_s25  ;;  %s2326_s29 = sadd.s32 4294967295, %s2220_s28   ;;  %s2220_s28 = sphi %s2311_s28, %s2714_s28   ;;  %s2216_s27 = sphi %s2309_s27, %s2716_s27   ;;  %s2212_s26 = sphi %s2307_s26, %s2718_s26   ;;  %s2208_s25 = sphi %s2305_s25, %s2717_s25  }
   0x9   : > { %2688 = sst [smem:[#allocation13_spill]] %s2216_s27  ;;  %s1423_s30 = sadd.s32 4294967294, %s2220_s28  }
   0xa   : > { %2689 = sst [smem:[#allocation14_spill]] %s2220_s28  ;;  %s2330_s14 = sadd.s32 1, %s2220_s28  }
   0xb   : > { %2690 = sst [smem:[#allocation15_spill]] %s2330_s14  ;;  %s313_s15 = sadd.s32 1, %s2216_s27 }
   0xc   : > { %s310_s16 = ssub.s32 %s2220_s28, %s2330_s14  ;;  %p323_p0 = scmp.ne.s32.totalorder %s2216_s27, %s2212_s26 }
   0xd   : > { %p311_p1 = scmp.eq.s32.totalorder %s310_s16, 0  ;;  %p324_p2 = scmp.eq.s32.totalorder %s2326_s29, 1 }
   0xe   : > { %p329_p3 = scmp.ne.s32.totalorder %s2212_s26, %s2208_s25  ;;  %p330_p4 = scmp.eq.s32.totalorder %s1423_s30, 1 }
   0xf   : > { %s2341_s17 = scalar_select %p311_p1, %s2216_s27, %s313_s15  }
  0x10   : > { %p2343_p5 = por %p324_p2, %p323_p0  ;;  %p2347_p6 = por %p330_p4, %p329_p3 }
  0x11   : > { %2691 = sst [smem:[#allocation16_spill]] %s2341_s17  ;;  %p1424_p7 = scmp.ge.s32.totalorder %s2220_s28, 1 }
  0x12   : > { %s2692_s18 = scalar_select %p2343_p5, 1, 0 }
  0x13   : > { %s2694_s19 = scalar_select %p2347_p6, 1, 0 }
  0x14   : > { %2693 = sst [smem:[#allocation17_spill]] %s2692_s18  ;;  %p337_p8 = scmp.lt.s32.totalorder %s2220_s28, 3 }
  0x15   : > { %2695 = sst [smem:[#allocation18_spill]] %s2694_s19  ;;  %p2678_p9 = scmp.eq.s32.totalorder %s2326_s29, 0 }
  0x16   : > { %p2354_p10 = pnand %p1424_p7, %p337_p8  ;;  %s2222_s21 = smov [#allocation5]  }
  0x17   : > { %s365_s22 = sshll.u32 %s2222_s21, 4  ;;  %s2223_s24 = smov [#allocation2]   ;;  %s2360_s22 = int_to_ptr.vmem [resolvable:$true] %s365_s22 }
  0x18   : > { %s2696_s20 = scalar_select %p2354_p10, 1, 0 }
  0x19   : > { %p2001_p11 = pneg %p2354_p10  ;;  %s349_s30 = sshll.u32 %s2223_s24, 4  ;;  %s2368_s30 = int_to_ptr.vmem [resolvable:$true] %s349_s30 }
  0x1a   : > { %s2224_s15 = smov [#allocation7]   ;;  %s2066_s14 = scalar_lea.hbm %s2662_s3, 6144 }
  0x1b   : > { %p2364_p12 = pnand %p2678_p9, %p2001_p11  ;;  %s2370_s16 = sshll.u32 %s2224_s15, 4  ;;  %s382_s16 = int_to_ptr.vmem [resolvable:$true] %s2370_s16 }
  0x1c   : > { %p2067_p13 = scmp.ne.s32.totalorder %s2662_s3, %s2066_s14  ;;  %p2073_p3 = scmp.lt.u32.totalorder %s2066_s14, %s2662_s3 }
  0x1d   : > { %p2380_p0 = pneg %p2364_p12 }
  0x1f   : > { %p2069_p1 = pnand %p2380_p0, %p2067_p13 }
  0x21   : > { %p2070_p2 = pneg %p2069_p1 }
  0x23   : > { %p2075_p4 = pnand %p2073_p3, %p2070_p2 }
  0x25   : > { %2078 = shalt.err (!%p2075_p4)
}
  0x26   : > { %s2079_s27 = scalar_lea.vmem %s2360_s22, 6144  ;;  %p2087_p9 = scmp.lt.s32.totalorder %s2360_s22, %s2360_s22 }
  0x27   : > { %p2080_p7 = scmp.ne.s32.totalorder %s2360_s22, %s2079_s27  ;;  %p2088_p6 = scmp.lt.s32.totalorder %s2079_s27, %s2079_s27 }
  0x29   : > { %p2082_p8 = pnand %p2080_p7, %p2380_p0  ;;  %p2089_p13 = por %p2088_p6, %p2087_p9 }
  0x2b   : > { %p2083_p11 = pneg %p2082_p8 }
  0x2d   : > { %p2090_p1 = pnand %p2089_p13, %p2083_p11 }
  0x2f   : > { %2093 = shalt.err (!%p2090_p1)
}
  0x30   : > { %s2225_s17 = smov 128   ;;  %s2226_s14 = smov 8  }
  0x31   : > { %2007 = dma.hbm_to_vmem [thread:$0]  (!%p2364_p12), %s2662_s3, 6144, %s2360_s22, [#allocation6], %s2225_s17, %s2225_s17, %s2226_s14  }
  0x32   : > { %s2094_s27 = scalar_lea.hbm %s2660_s1, 6144 }
  0x33   : > { %p2095_p6 = scmp.ne.s32.totalorder %s2660_s1, %s2094_s27  ;;  %p2101_p3 = scmp.lt.u32.totalorder %s2094_s27, %s2660_s1 }
  0x35   : > { %p2097_p9 = pnand %p2095_p6, %p2380_p0 }
  0x37   : > { %p2098_p2 = pneg %p2097_p9 }
  0x39   : > { %p2103_p4 = pnand %p2101_p3, %p2098_p2 }
  0x3b   : > { %2106 = shalt.err (!%p2103_p4)
}
  0x3c   : > { %s2107_s22 = scalar_lea.vmem %s2368_s30, 6144  ;;  %p2115_p13 = scmp.lt.s32.totalorder %s2368_s30, %s2368_s30 }
  0x3d   : > { %p2108_p7 = scmp.ne.s32.totalorder %s2368_s30, %s2107_s22  ;;  %p2116_p1 = scmp.lt.s32.totalorder %s2107_s22, %s2107_s22 }
  0x3f   : > { %p2110_p8 = pnand %p2108_p7, %p2380_p0  ;;  %p2117_p6 = por %p2116_p1, %p2115_p13 }
  0x41   : > { %p2111_p11 = pneg %p2110_p8 }
  0x43   : > { %p2118_p9 = pnand %p2117_p6, %p2111_p11 }
  0x45   : > { %2121 = shalt.err (!%p2118_p9)
}
  0x46   : > { %2004 = dma.hbm_to_vmem [thread:$0]  (!%p2364_p12), %s2660_s1, 6144, %s2368_s30, [#allocation3], %s2225_s17, %s2225_s17, %s2226_s14  }
  0x47   : > { %s2122_s19 = scalar_lea.hbm %s2664_s5, 6144 }
  0x48   : > { %p2123_p2 = scmp.ne.s32.totalorder %s2664_s5, %s2122_s19  ;;  %p2129_p7 = scmp.lt.u32.totalorder %s2122_s19, %s2664_s5 }
  0x4a   : > { %p2125_p3 = pnand %p2123_p2, %p2380_p0 }
  0x4c   : > { %p2126_p4 = pneg %p2125_p3 }
  0x4e   : > { %p2131_p8 = pnand %p2129_p7, %p2126_p4 }
  0x50   : > { %2134 = shalt.err (!%p2131_p8)
}
  0x51   : > { %s2135_s22 = scalar_lea.vmem %s382_s16, 6144  ;;  %p2143_p6 = scmp.lt.s32.totalorder %s382_s16, %s382_s16 }
  0x52   : > { %p2136_p11 = scmp.ne.s32.totalorder %s382_s16, %s2135_s22  ;;  %p2144_p9 = scmp.lt.s32.totalorder %s2135_s22, %s2135_s22 }
  0x54   : > { %p2138_p13 = pnand %p2136_p11, %p2380_p0  ;;  %p2145_p5 = por %p2144_p9, %p2143_p6 }
  0x56   : > { %p2139_p1 = pneg %p2138_p13 }
  0x58   : > { %p2146_p10 = pnand %p2145_p5, %p2139_p1 }
  0x5a   : > { %2149 = shalt.err (!%p2146_p10)
}
  0x5b   : > { %2010 = dma.hbm_to_vmem [thread:$0]  (!%p2364_p12), %s2664_s5, 6144, %s382_s16, [#allocation6], %s2225_s17, %s2225_s17, %s2226_s14  }
  0x5c   : > { %p2699_p2 = scmp.ne.s32.totalorder %s2696_s20, 0 }
  0x5d   : > { %p2700_p0 = scmp.eq.s32.totalorder (!%p2699_p2), %s2326_s29, 0 }
  0x5e   : > { %424 = sbr.rel (%p2699_p2) target bundleno = 1779 (0x6f3), region = 72 }
  0x65   : > { %2195 = dma.done.wait (%p2700_p0), [#allocation3], 6144   ;;  %p2701_p3 = pmov %p2700_p0 }
  0x66   : > { %p2702_p5 = pmov %p2700_p0 }
  0x67   : > { %2197 = vsyncadd (%p2701_p3), [#allocation3], 4294961152 }
  0x68   : > { %2199 = dma.done.wait (%p2702_p5), [#allocation6], 12288   ;;  %p2703_p10 = pmov %p2700_p0 }
  0x69   : > { %p473_p4 = scmp.lt.s32.totalorder %s2326_s29, 1  ;;  %v478_v0 = vlaneseq  ;;  %v2227_v1 = vmov 0.0|0.0   ;;  %vm2228_vm0 = vmmov 0   ;;  %v2229_v3 = vmov 0.0   ;;  %v508_v6 = vld [vmem:[#allocation2 + $0x80] sm:$0xff]  ;;  %v509_v7 = vld [vmem:[#allocation2 + $0x88] sm:$0xff] }
  0x6a   : > { %2201 = vsyncadd (%p2703_p10), [#allocation6], 4294955008  ;;  %1818 = vmatprep.subr.bf16.mxu1 %v2227_v1  ;;  %1660 = vmatprep.mubr.msk.f32.mxu1 %vm2228_vm0, %v2229_v3  ;;  %v1786_v9 = vpack.c.bf16 %v509_v7, %v508_v6  ;;  %v492_v10 = vld [vmem:[#allocation2] sm:$0xff]  ;;  %v493_v11 = vld [vmem:[#allocation2 + $0x8] sm:$0xff]  ;;  %s2230_s17 = smov 4   ;;  %s2231_s14 = smov 124  }
  0x6b   : > { %s474_s25 = scalar_select %p473_p4, %s2326_s29, 1  ;;  %v479_v2 = vshrl.u32 %v478_v0, 7  ;;  %v510_v12 = vld [vmem:[#allocation2 + $0x90] sm:$0xff]  ;;  %v1788_v13 = vpack.c.bf16 %v493_v11, %v492_v10  ;;  %v511_v14 = vld [vmem:[#allocation2 + $0x98] sm:$0xff]  ;;  %v524_v18 = vld [vmem:[#allocation2 + $0x100] sm:$0xff]  ;;  %vm488_vm1 = vcmask 31744  }
  0x6c   : > { %v494_v15 = vld [vmem:[#allocation2 + $0x10] sm:$0xff]  ;;  %v495_v16 = vld [vmem:[#allocation2 + $0x18] sm:$0xff]  ;;  %1787 = vmatprep.subr.bf16.mxu0 %v1786_v9  ;;  %v1790_v17 = vpack.c.bf16 %v511_v14, %v510_v12  ;;  %v525_v19 = vld [vmem:[#allocation2 + $0x108] sm:$0xff]  ;;  %vm490_vm3 = vcmask 1014784   ;;  %s2232_s18 = smov 8   ;;  %s2233_s19 = smov 120  }
  0x6d   : > { %s475_s16 = scalar_lea.vmem %s2659_s0, %s474_s25  ;;  %v480_v4 = vsub.s32 0, %v479_v2  ;;  %v512_v20 = vld [vmem:[#allocation2 + $0xa0] sm:$0xff]  ;;  %1789 = vmatpush3.bf16.msra.mxu0 %v1788_v13  ;;  %v1792_v21 = vpack.c.bf16 %v495_v16, %v494_v15  ;;  %v1819_v22 = vpack.c.bf16 %v525_v19, %v524_v18  ;;  %v513_v23 = vld [vmem:[#allocation2 + $0xa8] sm:$0xff]  ;;  %v526_v27 = vld [vmem:[#allocation2 + $0x110] sm:$0xff]  ;;  %vm689_vm4 = vcmask 64512   ;;  %s2706_s24 = sld [smem:[#allocation17_spill]] }
  0x6e   : > { %v476_v5 = vld [vmem:[%s475_s16] sm:$0x1]  ;;  %1791 = vmatprep.subr.bf16.mxu0 %v1790_v17  ;;  %v1794_v25 = vpack.c.bf16 %v513_v23, %v512_v20  ;;  %v497_v26 = vld [vmem:[#allocation2 + $0x28] sm:$0xff]  ;;  %v527_v28 = vld [vmem:[#allocation2 + $0x118] sm:$0xff]  ;;  %vm691_vm6 = vcmask 982016   ;;  %vm1175_vm7 = vcmask 261120  }
  0x6f   : > { %v481_v8 = vrot.slane %v476_v5, %v480_v4  ;;  %605 = vmatprep.mubr.f32.mxu0 %v476_v5  ;;  %v496_v24 = vld [vmem:[#allocation2 + $0x20] sm:$0xff]  ;;  %1820 = vmatpush3.bf16.msra.mxu1 %v1819_v22  ;;  %v1822_v29 = vpack.c.bf16 %v527_v28, %v526_v27  ;;  %v514_v30 = vld [vmem:[#allocation2 + $0xb0] sm:$0xff]  ;;  %v515_v31 = vld [vmem:[#allocation2 + $0xb8] sm:$0xff]  ;;  %vm1252_vm8 = vcmask 130048   ;;  %s471_s15 = sand.u32 1, %s2212_s26   ;;  %s2707_s30 = sld [smem:[#allocation19_spill]] }
  0x70   : > { %1821 = vmatprep.subr.bf16.mxu1 %v2227_v1  ;;  %v528_v32 = vld [vmem:[#allocation2 + $0x120] sm:$0xff]  ;;  %v529_v33 = vld [vmem:[#allocation2 + $0x128] sm:$0xff]  ;;  %v1796_v34 = vpack.c.bf16 %v497_v26, %v496_v24  ;;  %v1798_v35 = vpack.c.bf16 %v515_v31, %v514_v30  ;;  %v498_v36 = vld [vmem:[#allocation2 + $0x30] sm:$0xff]  ;;  %s1444_s12 = sshll.u32 %s2326_s29, 4  ;;  %s472_s25 = scalar_lea.vmem [#allocation8], %s471_s15 }
  0x71   : > { %482 = vrot.lane.b32.xlu0 %v481_v8, %s2230_s17  ;;  %1793 = vmatpush3.bf16.msra.mxu0 %v1792_v21  ;;  %v499_v37 = vld [vmem:[#allocation2 + $0x38] sm:$0xff]  ;;  %v1825_v38 = vpack.c.bf16 %v529_v33, %v528_v32  ;;  %v516_v39 = vld [vmem:[#allocation2 + $0xc0] sm:$0xff]  ;;  %v517_v40 = vld [vmem:[#allocation2 + $0xc8] sm:$0xff]  ;;  %s1340_s20 = sshll.u32 %s472_s25, 4  ;;  %s2708_s17 = sld [smem:[#allocation20_spill]]  ;;  %s2619_s20 = int_to_ptr.vmem [resolvable:$true] %s1340_s20 }
  0x72   : > { %1795 = vmatprep.subr.bf16.mxu0 %v1794_v25  ;;  %v530_v41 = vld [vmem:[#allocation2 + $0x130] sm:$0xff]  ;;  %v531_v42 = vld [vmem:[#allocation2 + $0x138] sm:$0xff]  ;;  %v1800_v43 = vpack.c.bf16 %v499_v37, %v498_v36  ;;  %v1802_v44 = vpack.c.bf16 %v517_v40, %v516_v39  ;;  %v500_v45 = vld [vmem:[#allocation2 + $0x40] sm:$0xff]  ;;  %s1328_s13 = scalar_lea.sflag [#allocation4], %s471_s15  ;;  %s2150_s28 = scalar_lea.vmem %s2619_s20, 16 }
  0x73   : > { %1823 = vmatpush3.bf16.msra.mxu1 %v1822_v29  ;;  %v501_v46 = vld [vmem:[#allocation2 + $0x48] sm:$0xff]  ;;  %v1828_v47 = vpack.c.bf16 %v531_v42, %v530_v41  ;;  %v518_v48 = vld [vmem:[#allocation2 + $0xd0] sm:$0xff]  ;;  %v519_v49 = vld [vmem:[#allocation2 + $0xd8] sm:$0xff]  ;;  %p2151_p12 = scmp.ne.s32.totalorder %s2619_s20, %s2150_s28  ;;  %p2709_p7 = scmp.ne.s32.totalorder %s2706_s24, 0 }
  0x74   : > { %1824 = vmatprep.subr.bf16.mxu1 %v2227_v1  ;;  %v532_v50 = vld [vmem:[#allocation2 + $0x140] sm:$0xff]  ;;  %v533_v51 = vld [vmem:[#allocation2 + $0x148] sm:$0xff]  ;;  %v1804_v52 = vpack.c.bf16 %v501_v46, %v500_v45  ;;  %v1806_v53 = vpack.c.bf16 %v519_v49, %v518_v48  ;;  %v502_v54 = vld [vmem:[#allocation2 + $0x50] sm:$0xff]  ;;  %s2234_s29 = smov [#allocation8]  }
  0x75   : > { %485 = vrot.lane.b32.xlu0 %v481_v8, %s2231_s14  ;;  %1797 = vmatpush3.bf16.msra.mxu0 %v1796_v34  ;;  %v503_v55 = vld [vmem:[#allocation2 + $0x58] sm:$0xff]  ;;  %v1831_v56 = vpack.c.bf16 %v533_v51, %v532_v50  ;;  %v520_v57 = vld [vmem:[#allocation2 + $0xe0] sm:$0xff]  ;;  %v521_v58 = vld [vmem:[#allocation2 + $0xe8] sm:$0xff]  ;;  %p2152_p8 = pnand %p2151_p12, %p2709_p7 }
  0x76   : > { %1799 = vmatprep.subr.bf16.mxu0 %v1798_v35  ;;  %v534_v59 = vld [vmem:[#allocation2 + $0x150] sm:$0xff]  ;;  %v535_v60 = vld [vmem:[#allocation2 + $0x158] sm:$0xff]  ;;  %v1808_v61 = vpack.c.bf16 %v503_v55, %v502_v54  ;;  %v1810_v62 = vpack.c.bf16 %v521_v58, %v520_v57  ;;  %v504_v63 = vld [vmem:[#allocation2 + $0x60] sm:$0xff] }
  0x77   : > { %1826 = vmatpush3.bf16.msra.mxu1 %v1825_v38  ;;  %v505_v0 = vld [vmem:[#allocation2 + $0x68] sm:$0xff]  ;;  %v1834_v2 = vpack.c.bf16 %v535_v60, %v534_v59  ;;  %v522_v4 = vld [vmem:[#allocation2 + $0xf0] sm:$0xff]  ;;  %v523_v5 = vld [vmem:[#allocation2 + $0xf8] sm:$0xff]  ;;  %s2617_s14 = scalar_lea.hbm %s2708_s17, %s1444_s12  ;;  %p2153_p11 = pneg %p2152_p8 }
  0x78   : > { %1827 = vmatprep.subr.bf16.mxu1 %v2227_v1  ;;  %v536_v6 = vld [vmem:[#allocation2 + $0x160] sm:$0xff]  ;;  %v537_v7 = vld [vmem:[#allocation2 + $0x168] sm:$0xff]  ;;  %v1812_v8 = vpack.c.bf16 %v505_v0, %v504_v63  ;;  %v1814_v9 = vpack.c.bf16 %v523_v5, %v522_v4  ;;  %v506_v10 = vld [vmem:[#allocation2 + $0x70] sm:$0xff] }
  0x79   : > { %1801 = vmatpush3.bf16.msra.mxu0 %v1800_v43  ;;  %v507_v11 = vld [vmem:[#allocation2 + $0x78] sm:$0xff]  ;;  %v1837_v12 = vpack.c.bf16 %v537_v7, %v536_v6  ;;  %v538_v13 = vld [vmem:[#allocation2 + $0x170] sm:$0xff]  ;;  %vm1433_vm2 = vmneg %vm488_vm1 }
  0x7a   : > { %1803 = vmatprep.subr.bf16.mxu0 %v1802_v44  ;;  %v539_v14 = vld [vmem:[#allocation2 + $0x178] sm:$0xff]  ;;  %v1816_v15 = vpack.c.bf16 %v507_v11, %v506_v10  ;;  %v709_v19 = vld [vmem:[#allocation5 + $0x80] sm:$0xff]  ;;  %v710_v20 = vld [vmem:[#allocation5 + $0x88] sm:$0xff] }
  0x7b   : > { %1829 = vmatpush3.bf16.msra.mxu1 %v1828_v47  ;;  %v1840_v16 = vpack.c.bf16 %v539_v14, %v538_v13  ;;  %v693_v21 = vld [vmem:[#allocation5] sm:$0xff]  ;;  %v1842_v22 = vpack.c.bf16 %v710_v20, %v709_v19  ;;  %v694_v23 = vld [vmem:[#allocation5 + $0x8] sm:$0xff]  ;;  %v711_v24 = vld [vmem:[#allocation5 + $0x90] sm:$0xff] }
  0x7c   : > { %1830 = vmatprep.subr.bf16.mxu1 %v2227_v1  ;;  %v712_v25 = vld [vmem:[#allocation5 + $0x98] sm:$0xff]  ;;  %v1844_v26 = vpack.c.bf16 %v694_v23, %v693_v21  ;;  %v695_v28 = vld [vmem:[#allocation5 + $0x10] sm:$0xff]  ;;  %v725_v30 = vld [vmem:[#allocation5 + $0x100] sm:$0xff] }
  0x7d   : > { %1805 = vmatpush3.bf16.msra.mxu0 %v1804_v52  ;;  %v1846_v27 = vpack.c.bf16 %v712_v25, %v711_v24  ;;  %v696_v29 = vld [vmem:[#allocation5 + $0x18] sm:$0xff]  ;;  %v726_v31 = vld [vmem:[#allocation5 + $0x108] sm:$0xff]  ;;  %v713_v32 = vld [vmem:[#allocation5 + $0xa0] sm:$0xff] }
  0x7e   : > { %1807 = vmatprep.subr.bf16.mxu0 %v1806_v53  ;;  %v714_v33 = vld [vmem:[#allocation5 + $0xa8] sm:$0xff]  ;;  %v1848_v34 = vpack.c.bf16 %v696_v29, %v695_v28  ;;  %v1875_v35 = vpack.c.bf16 %v726_v31, %v725_v30  ;;  %v727_v36 = vld [vmem:[#allocation5 + $0x110] sm:$0xff]  ;;  %v697_v38 = vld [vmem:[#allocation5 + $0x20] sm:$0xff] }
  0x7f   : > { %1832 = vmatpush3.bf16.msra.mxu1 %v1831_v56  ;;  %v1850_v37 = vpack.c.bf16 %v714_v33, %v713_v32  ;;  %v698_v39 = vld [vmem:[#allocation5 + $0x28] sm:$0xff]  ;;  %v728_v40 = vld [vmem:[#allocation5 + $0x118] sm:$0xff]  ;;  %v715_v42 = vld [vmem:[#allocation5 + $0xb0] sm:$0xff] }
  0x80   : > { %1833 = vmatprep.subr.bf16.mxu1 %v2227_v1  ;;  %v1878_v41 = vpack.c.bf16 %v728_v40, %v727_v36  ;;  %v716_v43 = vld [vmem:[#allocation5 + $0xb8] sm:$0xff]  ;;  %v729_v44 = vld [vmem:[#allocation5 + $0x120] sm:$0xff]  ;;  %v730_v45 = vld [vmem:[#allocation5 + $0x128] sm:$0xff]  ;;  %v1852_v46 = vpack.c.bf16 %v698_v39, %v697_v38 }
  0x81   : > { %1809 = vmatpush3.bf16.msra.mxu0 %v1808_v61  ;;  %v1854_v47 = vpack.c.bf16 %v716_v43, %v715_v42  ;;  %v699_v48 = vld [vmem:[#allocation5 + $0x30] sm:$0xff]  ;;  %v700_v49 = vld [vmem:[#allocation5 + $0x38] sm:$0xff]  ;;  %v1881_v50 = vpack.c.bf16 %v730_v45, %v729_v44  ;;  %v717_v51 = vld [vmem:[#allocation5 + $0xc0] sm:$0xff] }
  0x82   : > { %1811 = vmatprep.subr.bf16.mxu0 %v1810_v62  ;;  %v718_v52 = vld [vmem:[#allocation5 + $0xc8] sm:$0xff]  ;;  %v731_v53 = vld [vmem:[#allocation5 + $0x130] sm:$0xff]  ;;  %v732_v54 = vld [vmem:[#allocation5 + $0x138] sm:$0xff]  ;;  %v1856_v55 = vpack.c.bf16 %v700_v49, %v699_v48 }
  0x83   : > { %1835 = vmatpush3.bf16.msra.mxu1 %v1834_v2  ;;  %v1858_v56 = vpack.c.bf16 %v718_v52, %v717_v51  ;;  %v701_v57 = vld [vmem:[#allocation5 + $0x40] sm:$0xff]  ;;  %v702_v58 = vld [vmem:[#allocation5 + $0x48] sm:$0xff]  ;;  %v1884_v59 = vpack.c.bf16 %v732_v54, %v731_v53  ;;  %v719_v60 = vld [vmem:[#allocation5 + $0xd0] sm:$0xff] }
  0x84   : > { %1836 = vmatprep.subr.bf16.mxu1 %v2227_v1  ;;  %v720_v61 = vld [vmem:[#allocation5 + $0xd8] sm:$0xff]  ;;  %v733_v62 = vld [vmem:[#allocation5 + $0x140] sm:$0xff]  ;;  %v734_v63 = vld [vmem:[#allocation5 + $0x148] sm:$0xff]  ;;  %v1860_v0 = vpack.c.bf16 %v702_v58, %v701_v57 }
  0x85   : > { %1813 = vmatpush3.bf16.msra.mxu0 %v1812_v8  ;;  %v1862_v2 = vpack.c.bf16 %v720_v61, %v719_v60  ;;  %v703_v4 = vld [vmem:[#allocation5 + $0x50] sm:$0xff]  ;;  %v704_v5 = vld [vmem:[#allocation5 + $0x58] sm:$0xff]  ;;  %v1887_v6 = vpack.c.bf16 %v734_v63, %v733_v62  ;;  %v721_v7 = vld [vmem:[#allocation5 + $0xe0] sm:$0xff] }
  0x86   : > { %1815 = vmatprep.subr.bf16.mxu0 %v1814_v9  ;;  %v722_v8 = vld [vmem:[#allocation5 + $0xe8] sm:$0xff]  ;;  %v735_v9 = vld [vmem:[#allocation5 + $0x150] sm:$0xff]  ;;  %v736_v10 = vld [vmem:[#allocation5 + $0x158] sm:$0xff]  ;;  %v1864_v11 = vpack.c.bf16 %v704_v5, %v703_v4 }
  0x87   : > { %1838 = vmatpush3.bf16.msra.mxu1 %v1837_v12  ;;  %v1866_v12 = vpack.c.bf16 %v722_v8, %v721_v7  ;;  %v705_v13 = vld [vmem:[#allocation5 + $0x60] sm:$0xff]  ;;  %v706_v14 = vld [vmem:[#allocation5 + $0x68] sm:$0xff]  ;;  %v708_v23 = vld [vmem:[#allocation5 + $0x78] sm:$0xff] }
  0x88   : > { %1839 = vmatprep.subr.bf16.mxu1 %v2227_v1  ;;  %v738_v19 = vld [vmem:[#allocation5 + $0x168] sm:$0xff]  ;;  %v1868_v20 = vpack.c.bf16 %v706_v14, %v705_v13  ;;  %v540_v31 = vld [vmem:[%s2661_s2] sm:$0x1]  ;;  %vm2493_vm5 = vmneg %vm689_vm4 }
  0x89   : > { %1817 = vmatpush3.bf16.msra.mxu0 %v1816_v15  ;;  %v1890_v15 = vpack.c.bf16 %v736_v10, %v735_v9  ;;  %v909_v42 = vld [vmem:[#allocation7 + $0x88] sm:$0xff]  ;;  %v892_v43 = vld [vmem:[#allocation7] sm:$0xff]  ;;  %v911_v51 = vld [vmem:[#allocation7 + $0x98] sm:$0xff] }
  0x8a   : > { %1843 = vmatprep.subr.bf16.mxu0 %v1842_v22  ;;  %v707_v22 = vld [vmem:[#allocation5 + $0x70] sm:$0xff]  ;;  %v893_v45 = vld [vmem:[#allocation7 + $0x8] sm:$0xff]  ;;  %v895_v54 = vld [vmem:[#allocation7 + $0x18] sm:$0xff] }
  0x8b   : > { %1841 = vmatpush3.bf16.msra.mxu1 %v1840_v16  ;;  %v723_v16 = vld [vmem:[#allocation5 + $0xf0] sm:$0xff]  ;;  %v1872_v25 = vpack.c.bf16 %v708_v23, %v707_v22  ;;  %v1900_v48 = vpack.c.bf16 %v893_v45, %v892_v43  ;;  %v913_v60 = vld [vmem:[#allocation7 + $0xa8] sm:$0xff]  ;;  %v896_v61 = vld [vmem:[#allocation7 + $0x20] sm:$0xff] }
  0x8c   : > { %1874 = vmatprep.subr.bf16.mxu1 %v2227_v1  ;;  %v894_v52 = vld [vmem:[#allocation7 + $0x10] sm:$0xff]  ;;  %v897_v63 = vld [vmem:[#allocation7 + $0x28] sm:$0xff]  ;;  %v915_v5 = vld [vmem:[#allocation7 + $0xb8] sm:$0xff] }
  0x8d   : > { %v1904_v57 = vpack.c.bf16 %v895_v54, %v894_v52  ;;  %v914_v4 = vld [vmem:[#allocation7 + $0xb0] sm:$0xff]  ;;  %v899_v10 = vld [vmem:[#allocation7 + $0x38] sm:$0xff]  ;;  %v916_v13 = vld [vmem:[#allocation7 + $0xc0] sm:$0xff] }
  0x8e   : > { %v898_v8 = vld [vmem:[#allocation7 + $0x30] sm:$0xff]  ;;  %v1910_v9 = vpack.c.bf16 %v915_v5, %v914_v4  ;;  %v917_v14 = vld [vmem:[#allocation7 + $0xc8] sm:$0xff]  ;;  %v919_v23 = vld [vmem:[#allocation7 + $0xd8] sm:$0xff] }
  0x8f   : > { %v918_v22 = vld [vmem:[#allocation7 + $0xd0] sm:$0xff]  ;;  %v741_v54 = vld [vmem:[%s2663_s4] sm:$0x1] }
  0x90   : > { %v906_v45 = vld [vmem:[#allocation7 + $0x70] sm:$0xff] }
  0xe3   : > { %v483_v17 = vpop.permute.xlu0 %482 }
  0xe4   : > { %1434 = vmatmul.mubr.msk.f32.vlgmr.msra.gmra.mrb[0].mxu0 %vm1433_vm2, %v483_v17  ;;  %v724_v17 = vld [vmem:[#allocation5 + $0xf8] sm:$0xff] }
  0xe5   : > { %1845 = vmatpush3.bf16.msra.mxu0 %v1844_v26  ;;  %v1870_v21 = vpack.c.bf16 %v724_v17, %v723_v16  ;;  %v739_v26 = vld [vmem:[#allocation5 + $0x170] sm:$0xff]  ;;  %v900_v17 = vld [vmem:[#allocation7 + $0x40] sm:$0xff] }
  0xe6   : > { %1847 = vmatprep.subr.bf16.mxu0 %v1846_v27  ;;  %v740_v27 = vld [vmem:[#allocation5 + $0x178] sm:$0xff] }
  0xe7   : > { %v486_v18 = vpop.permute.xlu0 %485  ;;  %v1896_v28 = vpack.c.bf16 %v740_v27, %v739_v26  ;;  %v902_v26 = vld [vmem:[#allocation7 + $0x50] sm:$0xff]  ;;  %v1918_v27 = vpack.c.bf16 %v919_v23, %v918_v22  ;;  %v1097_v22 = vld [vmem:[%s2666_s7 + $0x78] sm:$0xff] }
  0xe8   : > { %1661 = vmatmul.mubr.msk.f32.vlgmr.msra.gmra.mrb[0].mxu1 %vm490_vm3, %v486_v18  ;;  %v737_v18 = vld [vmem:[#allocation5 + $0x160] sm:$0xff] }
  0xe9   : > { %1695 = vmatprep.mubr.msk.f32.mxu1 %vm2228_vm0, %v2229_v3  ;;  %1876 = vmatpush3.bf16.msra.mxu1 %v1875_v35  ;;  %v1893_v24 = vpack.c.bf16 %v738_v19, %v737_v18  ;;  %v1914_v18 = vpack.c.bf16 %v917_v14, %v916_v13  ;;  %v901_v19 = vld [vmem:[#allocation7 + $0x48] sm:$0xff] }
  0xea   : > { %1877 = vmatprep.subr.bf16.mxu1 %v2227_v1  ;;  %1849 = vmatpush3.bf16.msra.mxu0 %v1848_v34  ;;  %v1091_v13 = vld [vmem:[%s2666_s7 + $0x48] sm:$0xff] }
  0xeb   : > { %1851 = vmatprep.subr.bf16.mxu0 %v1850_v37 }
  0xed   : > { %1879 = vmatpush3.bf16.msra.mxu1 %v1878_v41  ;;  %v908_v41 = vld [vmem:[#allocation7 + $0x80] sm:$0xff] }
  0xee   : > { %1880 = vmatprep.subr.bf16.mxu1 %v2227_v1  ;;  %1853 = vmatpush3.bf16.msra.mxu0 %v1852_v46  ;;  %v1898_v44 = vpack.c.bf16 %v909_v42, %v908_v41  ;;  %v924_v46 = vld [vmem:[#allocation7 + $0x100] sm:$0xff]  ;;  %v922_v41 = vld [vmem:[#allocation7 + $0xf0] sm:$0xff]  ;;  %v923_v42 = vld [vmem:[#allocation7 + $0xf8] sm:$0xff] }
  0xef   : > { %1855 = vmatprep.subr.bf16.mxu0 %v1854_v47  ;;  %v925_v47 = vld [vmem:[#allocation7 + $0x108] sm:$0xff] }
  0xf0   : > { %v1931_v49 = vpack.c.bf16 %v925_v47, %v924_v46  ;;  %v1926_v46 = vpack.c.bf16 %v923_v42, %v922_v41  ;;  %v907_v47 = vld [vmem:[#allocation7 + $0x78] sm:$0xff]  ;;  %v1249_v41 = vld [vmem:[%s2670_s11] sm:$0xff]  ;;  %v1250_v42 = vld [vmem:[%s2670_s11 + $0x8] sm:$0xff] }
  0xf1   : > { %1882 = vmatpush3.bf16.msra.mxu1 %v1881_v50  ;;  %v910_v50 = vld [vmem:[#allocation7 + $0x90] sm:$0xff] }
  0xf2   : > { %1883 = vmatprep.subr.bf16.mxu1 %v2227_v1  ;;  %1857 = vmatpush3.bf16.msra.mxu0 %v1856_v55  ;;  %v1902_v53 = vpack.c.bf16 %v911_v51, %v910_v50  ;;  %v926_v55 = vld [vmem:[#allocation7 + $0x110] sm:$0xff]  ;;  %v1928_v50 = vpack.c.bf16 %v907_v47, %v906_v45  ;;  %v1174_v47 = vld [vmem:[%s2669_s10] sm:$0x1] }
  0xf3   : > { %1859 = vmatprep.subr.bf16.mxu0 %v1858_v56  ;;  %v927_v56 = vld [vmem:[#allocation7 + $0x118] sm:$0xff] }
  0xf4   : > { %v1934_v58 = vpack.c.bf16 %v927_v56, %v926_v55 }
  0xf5   : > { %1885 = vmatpush3.bf16.msra.mxu1 %v1884_v59  ;;  %v912_v59 = vld [vmem:[#allocation7 + $0xa0] sm:$0xff] }
  0xf6   : > { %1886 = vmatprep.subr.bf16.mxu1 %v2227_v1  ;;  %1861 = vmatpush3.bf16.msra.mxu0 %v1860_v0  ;;  %v1906_v62 = vpack.c.bf16 %v913_v60, %v912_v59  ;;  %v928_v0 = vld [vmem:[#allocation7 + $0x120] sm:$0xff] }
  0xf7   : > { %1863 = vmatprep.subr.bf16.mxu0 %v1862_v2  ;;  %v929_v2 = vld [vmem:[#allocation7 + $0x128] sm:$0xff] }
  0xf8   : > { %v1937_v7 = vpack.c.bf16 %v929_v2, %v928_v0  ;;  %v1084_v0 = vld [vmem:[%s2666_s7 + $0x10] sm:$0xff]  ;;  %v1085_v2 = vld [vmem:[%s2666_s7 + $0x18] sm:$0xff] }
  0xf9   : > { %1888 = vmatpush3.bf16.msra.mxu1 %v1887_v6  ;;  %v1908_v6 = vpack.c.bf16 %v897_v63, %v896_v61  ;;  %v1082_v61 = vld [vmem:[%s2666_s7] sm:$0xff] }
  0xfa   : > { %1889 = vmatprep.subr.bf16.mxu1 %v2227_v1  ;;  %1865 = vmatpush3.bf16.msra.mxu0 %v1864_v11  ;;  %v930_v11 = vld [vmem:[#allocation7 + $0x130] sm:$0xff] }
  0xfb   : > { %1867 = vmatprep.subr.bf16.mxu0 %v1866_v12  ;;  %v931_v12 = vld [vmem:[#allocation7 + $0x138] sm:$0xff] }
  0xfc   : > { %v1940_v16 = vpack.c.bf16 %v931_v12, %v930_v11  ;;  %v1090_v12 = vld [vmem:[%s2666_s7 + $0x40] sm:$0xff] }
  0xfd   : > { %1891 = vmatpush3.bf16.msra.mxu1 %v1890_v15  ;;  %v1912_v15 = vpack.c.bf16 %v899_v10, %v898_v8  ;;  %v1087_v8 = vld [vmem:[%s2666_s7 + $0x28] sm:$0xff]  ;;  %v1089_v10 = vld [vmem:[%s2666_s7 + $0x38] sm:$0xff]  ;;  %v1967_v14 = vpack.c.bf16 %v1091_v13, %v1090_v12 }
  0xfe   : > { %1892 = vmatprep.subr.bf16.mxu1 %v2227_v1  ;;  %1869 = vmatpush3.bf16.msra.mxu0 %v1868_v20  ;;  %v932_v20 = vld [vmem:[#allocation7 + $0x140] sm:$0xff] }
  0xff   : > { %1871 = vmatprep.subr.bf16.mxu0 %v1870_v21  ;;  %v933_v21 = vld [vmem:[#allocation7 + $0x148] sm:$0xff] }
 0x101   : > { %1894 = vmatpush3.bf16.msra.mxu1 %v1893_v24  ;;  %v1916_v24 = vpack.c.bf16 %v901_v19, %v900_v17  ;;  %v1095_v19 = vld [vmem:[%s2666_s7 + $0x68] sm:$0xff] }
 0x102   : > { %1895 = vmatprep.subr.bf16.mxu1 %v2227_v1  ;;  %1873 = vmatpush3.bf16.msra.mxu0 %v1872_v25  ;;  %v1943_v25 = vpack.c.bf16 %v933_v21, %v932_v20  ;;  %v1096_v21 = vld [vmem:[%s2666_s7 + $0x70] sm:$0xff] }
 0x103   : > { %1899 = vmatprep.subr.bf16.mxu0 %v1898_v44  ;;  %v1976_v23 = vpack.c.bf16 %v1097_v22, %v1096_v21 }
 0x105   : > { %1897 = vmatpush3.bf16.msra.mxu1 %v1896_v28  ;;  %v903_v28 = vld [vmem:[#allocation7 + $0x58] sm:$0xff] }
 0x106   : > { %1930 = vmatprep.subr.bf16.mxu1 %v2227_v1 }
 0x1b7   : > { %v1479_v29 = vpop.f32.mrb[0].mxu0 }
 0x1b8   : > { %v1480_v30 = vpop.f32.mrb[1].mxu0 }
 0x1b9   : > { %v1481_v32 = vadd.f32 %v1480_v30, %v1479_v29  ;;  %v934_v29 = vld [vmem:[#allocation7 + $0x150] sm:$0xff]  ;;  %v935_v30 = vld [vmem:[#allocation7 + $0x158] sm:$0xff] }
 0x1bb   : > { %v608_v33 = vadd.f32 %v1481_v32, %v540_v31  ;;  %v677_v34 = vpop.f32.mrb[0].mxu1  ;;  %v920_v31 = vld [vmem:[#allocation7 + $0xe0] sm:$0xff]  ;;  %v921_v32 = vld [vmem:[#allocation7 + $0xe8] sm:$0xff] }
 0x1bc   : > { %v1662_v35 = vpop.f32.mrb[1].mxu1 }
 0x1bd   : > { %v678_v36 = vadd.f32 %v677_v34, %v608_v33  ;;  %v1920_v33 = vpack.c.bf16 %v903_v28, %v902_v26  ;;  %v1946_v34 = vpack.c.bf16 %v935_v30, %v934_v29  ;;  %v904_v35 = vld [vmem:[#allocation7 + $0x60] sm:$0xff] }
 0x1be   : > { %v940_v29 = vld [vmem:[%s2665_s6] sm:$0x1] }
 0x1bf   : > { %v681_v37 = vmax.f32 %v678_v36, 0.0  ;;  %v1922_v36 = vpack.c.bf16 %v921_v32, %v920_v31 }
 0x1c1   : > { %683 = vrot.lane.b32.xlu1 %v681_v37, %s2232_s18  ;;  %806 = vmatprep.mubr.f32.mxu0 %v681_v37 }
 0x1c5   : > { %686 = vrot.lane.b32.xlu1 %v681_v37, %s2233_s19  ;;  %v905_v37 = vld [vmem:[#allocation7 + $0x68] sm:$0xff] }
 0x1c6   : > { %v1924_v43 = vpack.c.bf16 %v905_v37, %v904_v35  ;;  %v1173_v37 = vld [vmem:[%s2668_s9 + $0x18] sm:$0xff] }
 0x233   : > { %v684_v39 = vpop.permute.xlu1 %683 }
 0x234   : > { %1437 = vmatmul.mubr.msk.f32.vlgmr.msra.gmra.mrb[2].mxu0 %vm2493_vm5, %v684_v39  ;;  %v936_v39 = vld [vmem:[#allocation7 + $0x160] sm:$0xff] }
 0x235   : > { %1901 = vmatpush3.bf16.msra.mxu0 %v1900_v48  ;;  %v938_v48 = vld [vmem:[#allocation7 + $0x170] sm:$0xff] }
 0x236   : > { %1903 = vmatprep.subr.bf16.mxu0 %v1902_v53 }
 0x237   : > { %v687_v40 = vpop.permute.xlu1 %686 }
 0x238   : > { %1696 = vmatmul.mubr.msk.f32.vlgmr.msra.gmra.mrb[2].mxu1 %vm691_vm6, %v687_v40  ;;  %v937_v40 = vld [vmem:[#allocation7 + $0x168] sm:$0xff] }
 0x239   : > { %1730 = vmatprep.mubr.msk.f32.mxu1 %vm2228_vm0, %v2229_v3  ;;  %1932 = vmatpush3.bf16.msra.mxu1 %v1931_v49  ;;  %v1949_v44 = vpack.c.bf16 %v937_v40, %v936_v39  ;;  %v939_v49 = vld [vmem:[#allocation7 + $0x178] sm:$0xff]  ;;  %v1098_v40 = vld [vmem:[%s2667_s8] sm:$0x1] }
 0x23a   : > { %1933 = vmatprep.subr.bf16.mxu1 %v2227_v1  ;;  %1905 = vmatpush3.bf16.msra.mxu0 %v1904_v57  ;;  %v1952_v51 = vpack.c.bf16 %v939_v49, %v938_v48 }
 0x23b   : > { %1907 = vmatprep.subr.bf16.mxu0 %v1906_v62  ;;  %v1083_v62 = vld [vmem:[%s2666_s7 + $0x8] sm:$0xff] }
 0x23c   : > { %v1955_v63 = vpack.c.bf16 %v1083_v62, %v1082_v61 }
 0x23d   : > { %1935 = vmatpush3.bf16.msra.mxu1 %v1934_v58 }
 0x23e   : > { %1936 = vmatprep.subr.bf16.mxu1 %v2227_v1  ;;  %1909 = vmatpush3.bf16.msra.mxu0 %v1908_v6  ;;  %v1958_v6 = vpack.c.bf16 %v1085_v2, %v1084_v0 }
 0x23f   : > { %1911 = vmatprep.subr.bf16.mxu0 %v1910_v9  ;;  %v1088_v9 = vld [vmem:[%s2666_s7 + $0x30] sm:$0xff] }
 0x240   : > { %v1964_v11 = vpack.c.bf16 %v1089_v10, %v1088_v9 }
 0x241   : > { %1938 = vmatpush3.bf16.msra.mxu1 %v1937_v7  ;;  %v1086_v7 = vld [vmem:[%s2666_s7 + $0x20] sm:$0xff] }
 0x242   : > { %1939 = vmatprep.subr.bf16.mxu1 %v2227_v1  ;;  %1913 = vmatpush3.bf16.msra.mxu0 %v1912_v15  ;;  %v1961_v38 = vpack.c.bf16 %v1087_v8, %v1086_v7  ;;  %v1092_v15 = vld [vmem:[%s2666_s7 + $0x50] sm:$0xff] }
 0x243   : > { %1915 = vmatprep.subr.bf16.mxu0 %v1914_v18  ;;  %v1094_v18 = vld [vmem:[%s2666_s7 + $0x60] sm:$0xff] }
 0x244   : > { %v1973_v20 = vpack.c.bf16 %v1095_v19, %v1094_v18 }
 0x245   : > { %1941 = vmatpush3.bf16.msra.mxu1 %v1940_v16  ;;  %v1093_v16 = vld [vmem:[%s2666_s7 + $0x58] sm:$0xff] }
 0x246   : > { %1942 = vmatprep.subr.bf16.mxu1 %v2227_v1  ;;  %1917 = vmatpush3.bf16.msra.mxu0 %v1916_v24  ;;  %v1970_v17 = vpack.c.bf16 %v1093_v16, %v1092_v15  ;;  %v1170_v24 = vld [vmem:[%s2668_s9] sm:$0xff] }
 0x247   : > { %1919 = vmatprep.subr.bf16.mxu0 %v1918_v27 }
 0x249   : > { %1944 = vmatpush3.bf16.msra.mxu1 %v1943_v25  ;;  %v1171_v25 = vld [vmem:[%s2668_s9 + $0x8] sm:$0xff] }
 0x24a   : > { %1945 = vmatprep.subr.bf16.mxu1 %v2227_v1  ;;  %1921 = vmatpush3.bf16.msra.mxu0 %v1920_v33  ;;  %v1979_v26 = vpack.c.bf16 %v1171_v25, %v1170_v24 }
 0x24b   : > { %1923 = vmatprep.subr.bf16.mxu0 %v1922_v36  ;;  %v1172_v36 = vld [vmem:[%s2668_s9 + $0x10] sm:$0xff] }
 0x24c   : > { %v1982_v39 = vpack.c.bf16 %v1173_v37, %v1172_v36 }
 0x24d   : > { %1947 = vmatpush3.bf16.msra.mxu1 %v1946_v34 }
 0x24e   : > { %1948 = vmatprep.subr.bf16.mxu1 %v2227_v1  ;;  %1925 = vmatpush3.bf16.msra.mxu0 %v1924_v43 }
 0x24f   : > { %1927 = vmatprep.subr.bf16.mxu0 %v1926_v46  ;;  %v1985_v46 = vpack.c.bf16 %v1250_v42, %v1249_v41 }
 0x251   : > { %1950 = vmatpush3.bf16.msra.mxu1 %v1949_v44 }
 0x252   : > { %1951 = vmatprep.subr.bf16.mxu1 %v2227_v1  ;;  %1929 = vmatpush3.bf16.msra.mxu0 %v1928_v50 }
 0x253   : > { %1954 = vmatprep.subr.bf16.mxu0 %v2227_v1 }
 0x255   : > { %1953 = vmatpush3.bf16.msra.mxu1 %v1952_v51  ;;  %v1251_v51 = vld [vmem:[%s2707_s30] sm:$0x1] }
 0x256   : > { %1978 = vmatprep.subr.bf16.mxu1 %v2227_v1 }
 0x307   : > { %v1531_v52 = vpop.f32.mrb[2].mxu0 }
 0x308   : > { %v1532_v53 = vpop.f32.mrb[3].mxu0 }
 0x309   : > { %v1533_v55 = vadd.f32 %v1532_v53, %v1531_v52 }
 0x30b   : > { %v809_v56 = vadd.f32 %v1533_v55, %v741_v54  ;;  %v878_v57 = vpop.f32.mrb[2].mxu1 }
 0x30c   : > { %v1697_v58 = vpop.f32.mrb[3].mxu1 }
 0x30d   : > { %v879_v59 = vadd.f32 %v878_v57, %v809_v56 }
 0x30f   : > { %v882_v60 = vmax.f32 %v879_v59, 0.0 }
 0x311   : > { %887 = vrot.lane.b32.xlu1 %v882_v60, %s2233_s19  ;;  %884 = vrot.lane.b32.xlu0 %v882_v60, %s2232_s18  ;;  %s2154_s18 = sshll.u32 %s2234_s29, 4  ;;  %s2155_s18 = int_to_ptr.vmem [resolvable:$false] %s2154_s18 }
 0x312   : > { %1005 = vmatprep.mubr.f32.mxu0 %v882_v60  ;;  %s2156_s19 = scalar_lea.vmem %s2155_s18, 32  ;;  %p2157_p13 = scmp.lt.s32.totalorder %s2619_s20, %s2155_s18 }
 0x313   : > { %p2158_p1 = scmp.lt.s32.totalorder %s2156_s19, %s2150_s28 }
 0x315   : > { %p2159_p6 = por %p2158_p1, %p2157_p13 }
 0x317   : > { %p2160_p9 = pnand %p2159_p6, %p2153_p11 }
 0x383   : > { %v888_v4 = vpop.permute.xlu1 %887  ;;  %v885_v5 = vpop.permute.xlu0 %884 }
 0x384   : > { %1440 = vmatmul.mubr.msk.f32.vlgmr.msra.gmra.mrb[4].mxu0 %vm2493_vm5, %v885_v5  ;;  %1731 = vmatmul.mubr.msk.f32.vlgmr.msra.gmra.mrb[4].mxu1 %vm691_vm6, %v888_v4 }
 0x385   : > { %1956 = vmatpush3.bf16.msra.mxu0 %v1955_v63  ;;  %1765 = vmatprep.mubr.msk.f32.mxu0 %vm2228_vm0, %v2229_v3 }
 0x386   : > { %1957 = vmatprep.subr.bf16.mxu0 %v2227_v1  ;;  %1776 = vmatprep.mubr.msk.f32.mxu1 %vm2228_vm0, %v2229_v3 }
 0x387   : > { %1980 = vmatpush3.bf16.msra.mxu1 %v1979_v26 }
 0x388   : > { %1981 = vmatprep.subr.bf16.mxu1 %v2227_v1 }
 0x389   : > { %1959 = vmatpush3.bf16.msra.mxu0 %v1958_v6 }
 0x38a   : > { %1960 = vmatprep.subr.bf16.mxu0 %v2227_v1 }
 0x38b   : > { %1983 = vmatpush3.bf16.msra.mxu1 %v1982_v39 }
 0x38c   : > { %1984 = vmatprep.subr.bf16.mxu1 %v2227_v1 }
 0x38d   : > { %1962 = vmatpush3.bf16.msra.mxu0 %v1961_v38 }
 0x38e   : > { %1963 = vmatprep.subr.bf16.mxu0 %v2227_v1 }
 0x391   : > { %1965 = vmatpush3.bf16.msra.mxu0 %v1964_v11 }
 0x392   : > { %1966 = vmatprep.subr.bf16.mxu0 %v2227_v1 }
 0x395   : > { %1968 = vmatpush3.bf16.msra.mxu0 %v1967_v14 }
 0x396   : > { %1969 = vmatprep.subr.bf16.mxu0 %v2227_v1 }
 0x399   : > { %1971 = vmatpush3.bf16.msra.mxu0 %v1970_v17 }
 0x39a   : > { %1972 = vmatprep.subr.bf16.mxu0 %v2227_v1 }
 0x39d   : > { %1974 = vmatpush3.bf16.msra.mxu0 %v1973_v20 }
 0x39e   : > { %1975 = vmatprep.subr.bf16.mxu0 %v2227_v1 }
 0x3a1   : > { %1977 = vmatpush3.bf16.msra.mxu0 %v1976_v23 }
 0x457   : > { %v1583_v27 = vpop.f32.mrb[4].mxu0  ;;  %v1077_v28 = vpop.f32.mrb[4].mxu1 }
 0x458   : > { %v1584_v30 = vpop.f32.mrb[5].mxu0  ;;  %v1732_v31 = vpop.f32.mrb[5].mxu1 }
 0x459   : > { %v1585_v32 = vadd.f32 %v1584_v30, %v1583_v27 }
 0x45b   : > { %v1008_v33 = vadd.f32 %v1585_v32, %v940_v29 }
 0x45d   : > { %v1078_v34 = vadd.f32 %v1077_v28, %v1008_v33 }
 0x45f   : > { %v1081_v35 = vmax.f32 %v1078_v34, 0.0 }
 0x461   : > { %1766 = vmatmul.mubr.f32.vlgmr.msra.gmra.mrb[6].mxu0 %v1081_v35 }
 0x534   : > { %v1165_v43 = vpop.f32.mrb[6].mxu0 }
 0x535   : > { %v1166_v44 = vadd.f32 %v1165_v43, %v1098_v40  ;;  %v1767_v45 = vpop.f32.mrb[7].mxu0 }
 0x537   : > { %v1169_v1 = vmax.f32 %v1166_v44, 0.0 }
 0x539   : > { %1777 = vmatmul.mubr.msk.f32.vlgmr.msra.gmra.mrb[6].mxu1 %vm1175_vm7, %v1169_v1 }
 0x53a   : > { %1986 = vmatpush3.bf16.msra.mxu1 %v1985_v46  ;;  %1783 = vmatprep.mubr.msk.f32.mxu1 %vm2228_vm0, %v2229_v3 }
 0x60c   : > { %v1245_v48 = vpop.f32.mrb[6].mxu1 }
 0x60d   : > { %v1246_v49 = vadd.f32 %v1245_v48, %v1174_v47  ;;  %v1778_v50 = vpop.f32.mrb[7].mxu1 }
 0x60f   : > { %1784 = vmatmul.mubr.msk.f32.vlgmr.msra.gmra.mrb[8].mxu1 %vm1252_vm8, %v1246_v49 }
 0x6e2   : > { %v1322_v52 = vpop.f32.mrb[8].mxu1 }
 0x6e3   : > { %v1323_v3 = vadd.f32 %v1322_v52, %v1251_v51  ;;  %v1785_v53 = vpop.f32.mrb[9].mxu1 }
 0x6e5   : > { %1326 = vst [vmem:[%s472_s25] sm:$0x1] %v1323_v3 }
 0x6e6   : > { %2163 = shalt.err (!%p2160_p9)
}
 0x6e7   : > { %s2164_s21 = scalar_lea.hbm %s2617_s14, 16  ;;  %s2168_s22 = scalar_lea.hbm %s2708_s17, 32 }
 0x6e8   : > { %p2165_p2 = scmp.ne.s32.totalorder %s2617_s14, %s2164_s21  ;;  %p2169_p5 = scmp.lt.u32.totalorder %s2617_s14, %s2708_s17 }
 0x6e9   : > { %p2170_p10 = scmp.lt.u32.totalorder %s2168_s22, %s2164_s21  ;;  %p2172_p12 = scmp.lt.u32.totalorder %s2164_s21, %s2617_s14 }
 0x6ea   : > { %p2166_p0 = pnand %p2165_p2, %p2709_p7 }
 0x6eb   : > { %p2171_p4 = por %p2170_p10, %p2169_p5 }
 0x6ec   : > { %p2167_p3 = pneg %p2166_p0 }
 0x6ed   : > { %p2173_p8 = por %p2172_p12, %p2171_p4 }
 0x6ef   : > { %p2174_p11 = pnand %p2173_p8, %p2167_p3 }
 0x6f1   : > { %2177 = shalt.err (!%p2174_p11)
}
 0x6f2   : > { %1999 = dma.vmem_to_hbm [thread:$0]  (%p2709_p7), %s2619_s20, 16, %s2617_s14, %s1328_s13  }
 0x6f3 PF: > { %s2710_s25 = sld [smem:[#allocation14_spill]]  ;;  %s2711_s23 = sld [smem:[#allocation12_spill]] }
 0x6f4   : > { %s2712_s16 = sld [smem:[#allocation18_spill]] }
 0x6f9   : > { %p2021_p13 = scmp.ge.s32.totalorder %s2710_s25, 2  ;;  %s1352_s28 = sand.u32 1, %s2711_s23  }
 0x6fa   : > { %p2713_p1 = scmp.ne.s32.totalorder %s2712_s16, 0  ;;  %s1353_s29 = scalar_lea.sflag [#allocation4], %s1352_s28 }
 0x6fc   : > { %p2012_p6 = pnand %p2021_p13, %p2713_p1 }
 0x6fe   : > { %2203 = dma.done.wait (!%p2012_p6), %s1353_s29, 16  }
 0x6ff   : > { %2205 = vsyncadd (!%p2012_p6), %s1353_s29, 4294967280  ;;  %s2714_s28 = sld [smem:[#allocation15_spill]]  ;;  %s2715_s18 = sld [smem:[#allocation13_spill]] }
 0x700   : > { %s2716_s27 = sld [smem:[#allocation16_spill]]  ;;  %s2717_s25 = smov %s2212_s26 }
 0x705   : > { %p25_p9 = scmp.ge.s32.totalorder %s2714_s28, 4   ;;  %s2718_s26 = smov %s2715_s18 }
 0x707   :  { %27 = sbr.rel (!%p25_p9) target bundleno = 8 (0x8), region = 120 }
 0x70e   :  { %1357 = vsyncpa [#allocation3], 1 }
 0x70f   :  { %1359 = vsyncpa [#allocation3 + $0x1], 1 }
 0x710   :  { %1360 = vsyncpa [#allocation6], 1 }
 0x711   :  { %1361 = vsyncpa [#allocation4], 1 }
 0x712   :  { %1363 = vsyncpa [#allocation4 + $0x1], 1 }

</bundles_post_ra>
